<compile_context>
chip_gen: v5e
topology: v5e:2x2
jax: 0.10.0
libtpu: 0.0.40
codegen_flags: <defaults>
</compile_context>

<pallas_src>
import functools
import numpy as np

import jax
import jax.numpy as jnp
from jax import lax
from jax.experimental import pallas as pl
from jax.experimental.pallas import tpu as pltpu

PRIMITIVES = ['none', 'max_pool_3x3', 'avg_pool_3x3', 'skip_connect',
              'sep_conv_3x3', 'sep_conv_5x5', 'dil_conv_3x3', 'dil_conv_5x5']
RNN_PRIMITIVES = ['none', 'tanh', 'relu', 'sigmoid', 'identity']

_VMEM_LIMIT = 32 * 1024 * 1024   # conservative: fits scoped VMEM on v5e/v6e/v7x


def _round_up(x, m):
    return ((x + m - 1) // m) * m


def _row_tile(rows):
    """Row tile that divides `rows`; prefer >=2 grid steps (megacore sharding)."""
    for t in (512, 256, 128, 64, 32, 16, 8):
        if rows % t == 0 and rows // t >= 2:
            return t, rows // t
    return rows, 1


def _pack_rc(N, H, W, C):
    """Pick a (rows, cols) packing of an NHWC tensor with the lane dim (cols)
    as dense as possible (multiple of 128 when achievable).  Returns
    (rows, cols, rep) where cols == rep * C (rep = per-channel repetition of
    the scale/shift vectors)."""
    wc, hwc = W * C, H * W * C
    if wc % 128 == 0:
        return N * H, wc, W
    if hwc % 128 == 0 and hwc <= 32768:
        return N, hwc, H * W
    if wc >= 128:
        return N * H, wc, W
    return N, hwc, H * W


# ----------------------------------------------------------------------------
# GEMM: gridded, pipelined, bf16 MXU operands, f32 accumulator
# ----------------------------------------------------------------------------

def _gemm_kernel(a_ref, b_ref, bias_ref, o_ref, acc_ref, *, relu_a):
    @pl.when(pl.program_id(2) == 0)
    def _():
        acc_ref[...] = jnp.zeros_like(acc_ref)

    a = a_ref[...]
    if relu_a:                      # fused ReLU on the un-expanded operand tile
        a = jnp.maximum(a, 0)
    acc_ref[...] += jnp.dot(a, b_ref[...], preferred_element_type=jnp.float32)

    @pl.when(pl.program_id(2) == pl.num_programs(2) - 1)
    def _():
        o_ref[...] = acc_ref[...] + bias_ref[...]


@functools.partial(jax.jit, static_argnames=('relu_a',))
def gemm(a, b, bias=None, *, relu_a=False):
    """out = (relu?(a)) @ b + bias  with M/N/K tiling and double-buffered DMA."""
    M, K = a.shape
    _, N = b.shape
    tm = min(256, _round_up(M, 8))
    tn = min(256, _round_up(N, 128))
    tk = min(256, _round_up(K, 128))
    Mp, Np, Kp = _round_up(M, tm), _round_up(N, tn), _round_up(K, tk)
    a_p = jnp.pad(a.astype(jnp.bfloat16), ((0, Mp - M), (0, Kp - K)))
    b_p = jnp.pad(b.astype(jnp.bfloat16), ((0, Kp - K), (0, Np - N)))
    if bias is None:
        bias_p = jnp.zeros((1, Np), jnp.float32)
    else:
        bias_p = jnp.pad(bias.reshape(1, N).astype(jnp.float32),
                         ((0, 0), (0, Np - N)))
    grid = (Mp // tm, Np // tn, Kp // tk)
    cost = pl.CostEstimate(
        flops=2 * M * N * K, transcendentals=0,
        bytes_accessed=int(2 * (Mp * Kp + Kp * Np) + 4 * (Mp * Np + Np)))
    out = pl.pallas_call(
        functools.partial(_gemm_kernel, relu_a=relu_a),
        grid=grid,
        in_specs=[pl.BlockSpec((tm, tk), lambda i, j, k: (i, k)),
                  pl.BlockSpec((tk, tn), lambda i, j, k: (k, j)),
                  pl.BlockSpec((1, tn), lambda i, j, k: (0, j))],
        out_specs=pl.BlockSpec((tm, tn), lambda i, j, k: (i, j)),
        out_shape=jax.ShapeDtypeStruct((Mp, Np), jnp.float32),
        scratch_shapes=[pltpu.VMEM((tm, tn), jnp.float32)],
        compiler_params=pltpu.CompilerParams(
            dimension_semantics=("parallel", "parallel", "arbitrary"),
            vmem_limit_bytes=_VMEM_LIMIT),
        cost_estimate=cost,
    )(a_p, b_p, bias_p)
    return out[:M, :N]


# ----------------------------------------------------------------------------
# BatchNorm (train-mode): gridded stats reduction + fused scale/shift apply
# ----------------------------------------------------------------------------

def _bn_stats_kernel(x_ref, sum_ref, ssq_ref):
    @pl.when(pl.program_id(0) == 0)
    def _():
        sum_ref[...] = jnp.zeros_like(sum_ref)
        ssq_ref[...] = jnp.zeros_like(ssq_ref)
    x = x_ref[...]
    sum_ref[...] += jnp.sum(x, axis=0, keepdims=True)
    ssq_ref[...] += jnp.sum(x * x, axis=0, keepdims=True)


def _affine_kernel(x_ref, s_ref, b_ref, o_ref):
    o_ref[...] = x_ref[...] * s_ref[...] + b_ref[...]


def _affine_acc_kernel(acc_ref, x_ref, s_ref, b_ref, o_ref):
    o_ref[...] = acc_ref[...] + x_ref[...] * s_ref[...] + b_ref[...]


@jax.jit
def bn_fold(y4, arch_w=None, gamma=None, beta=None):
    """Fold train-mode BatchNorm2d (and optional architecture weight) into a
    per-channel (scale, shift) pair.  Stats come from a gridded Pallas reduction
    on a lane-dense (rows, cols) packing."""
    N, H, W, C = y4.shape
    rows, cols, rep = _pack_rc(N, H, W, C)
    tr, grid = _row_tile(rows)
    s, ss = pl.pallas_call(
        _bn_stats_kernel,
        grid=(grid,),
        in_specs=[pl.BlockSpec((tr, cols), lambda i: (i, 0))],
        out_specs=[pl.BlockSpec((1, cols), lambda i: (0, 0)),
                   pl.BlockSpec((1, cols), lambda i: (0, 0))],
        out_shape=[jax.ShapeDtypeStruct((1, cols), jnp.float32),
                   jax.ShapeDtypeStruct((1, cols), jnp.float32)],
        compiler_params=pltpu.CompilerParams(
            dimension_semantics=("arbitrary",), vmem_limit_bytes=_VMEM_LIMIT),
    )(y4.reshape(rows, cols).astype(jnp.float32))
    n = float(N * H * W)
    csum = s.reshape(rep, C).sum(axis=0)
    csq = ss.reshape(rep, C).sum(axis=0)
    mean = csum / n
    var = jnp.maximum(csq / n - mean * mean, 0.0)
    g = jnp.ones((C,), jnp.float32) if gamma is None else gamma.reshape(-1).astype(jnp.float32)
    b = jnp.zeros((C,), jnp.float32) if beta is None else beta.reshape(-1).astype(jnp.float32)
    scale = g * lax.rsqrt(var + 1e-5)
    shift = b - mean * scale
    if arch_w is not None:
        scale = scale * arch_w
        shift = shift * arch_w
    return scale, shift


@jax.jit
def affine_apply(x4, scale, shift, acc4=None):
    """out = (acc4 +) x*scale + shift, per channel, on lane-dense (rows, cols)
    tiles.  With acc4 this is the in-place mixed-op accumulation
    (input_output_aliases)."""
    N, H, W, C = x4.shape
    rows, cols, rep = _pack_rc(N, H, W, C)
    tr, grid = _row_tile(rows)
    x2 = x4.reshape(rows, cols).astype(jnp.float32)
    s2 = jnp.tile(scale.reshape(-1).astype(jnp.float32), rep).reshape(1, cols)
    b2 = jnp.tile(shift.reshape(-1).astype(jnp.float32), rep).reshape(1, cols)
    row_spec = pl.BlockSpec((tr, cols), lambda i: (i, 0))
    vec_spec = pl.BlockSpec((1, cols), lambda i: (0, 0))
    cp = pltpu.CompilerParams(dimension_semantics=("parallel",),
                              vmem_limit_bytes=_VMEM_LIMIT)
    if acc4 is None:
        y2 = pl.pallas_call(
            _affine_kernel, grid=(grid,),
            in_specs=[row_spec, vec_spec, vec_spec], out_specs=row_spec,
            out_shape=jax.ShapeDtypeStruct((rows, cols), jnp.float32),
            compiler_params=cp,
        )(x2, s2, b2)
    else:
        a2 = acc4.reshape(rows, cols).astype(jnp.float32)
        y2 = pl.pallas_call(
            _affine_acc_kernel, grid=(grid,),
            in_specs=[row_spec, row_spec, vec_spec, vec_spec], out_specs=row_spec,
            out_shape=jax.ShapeDtypeStruct((rows, cols), jnp.float32),
            input_output_aliases={0: 0},
            compiler_params=cp,
        )(a2, x2, s2, b2)
    return y2.reshape(N, H, W, C)


# ----------------------------------------------------------------------------
# Depthwise conv: VPU shifted-accumulate kernel (no block-diagonal GEMM)
# ----------------------------------------------------------------------------

def _dw_kernel(xs_ref, w_ref, o_ref, *, k, dil):
    xs = xs_ref[...]                        # (1, k*Hp, Wo, C): k W-shifted slabs
    Hp = xs_ref.shape[1] // k
    Hf = o_ref.shape[1]
    acc = jnp.zeros(o_ref.shape, jnp.float32)
    for j in range(k):                      # W tap (pre-shifted / pre-strided slab j)
        base = j * Hp
        for i in range(k):                  # H tap: leading-dim slice (cheap)
            w_ij = w_ref[i * k + j, :]
            acc = acc + (xs[:, base + i * dil: base + i * dil + Hf, :, :]
                         * w_ij[None, None, None, :])
    o_ref[...] = acc


@functools.partial(jax.jit, static_argnames=('stride', 'pad', 'dil', 'relu_in'))
def depthwise_conv2d(x4, w, *, stride, pad, dil, relu_in):
    """groups=C conv as a per-channel shifted multiply-accumulate on the VPU."""
    N, H, W, C = x4.shape
    k = w.shape[0]
    x = jnp.maximum(x4, 0.0) if relu_in else x4     # fused by XLA into slab build
    xp = jnp.pad(x, ((0, 0), (pad, pad), (pad, pad), (0, 0))).astype(jnp.float32)
    Hp, Wp = H + 2 * pad, W + 2 * pad
    Hf = Hp - dil * (k - 1)                          # full-resolution output rows
    Wo = (Wp - dil * (k - 1) - 1) // stride + 1      # W-strided output cols
    # k W-pre-shifted (and W-pre-strided) slabs (k x input vs k^2 for im2col);
    # H taps shift inside the kernel.
    xs = jnp.concatenate(
        [xp[:, :, j * dil: j * dil + (Wo - 1) * stride + 1: stride, :]
         for j in range(k)], axis=1)
    wf = w.reshape(k * k, C).astype(jnp.float32)
    y = pl.pallas_call(
        functools.partial(_dw_kernel, k=k, dil=dil),
        grid=(N,),
        in_specs=[pl.BlockSpec((1, k * Hp, Wo, C), lambda n: (n, 0, 0, 0)),
                  pl.BlockSpec((k * k, C), lambda n: (0, 0))],
        out_specs=pl.BlockSpec((1, Hf, Wo, C), lambda n: (n, 0, 0, 0)),
        out_shape=jax.ShapeDtypeStruct((N, Hf, Wo, C), jnp.float32),
        compiler_params=pltpu.CompilerParams(
            dimension_semantics=("parallel",), vmem_limit_bytes=_VMEM_LIMIT),
    )(xs, wf)
    if stride > 1:
        # TODO(synk): fold the H output stride into the kernel as well.
        y = y[:, ::stride, :, :]
    return y


# ----------------------------------------------------------------------------
# 3x3 pooling: single kernel, all 9 taps, avg count folded in
# ----------------------------------------------------------------------------

def _maxpool_kernel(xs_ref, o_ref):
    xs = xs_ref[...]                        # (1, 3*Hp, Wo, C)
    Hp = xs_ref.shape[1] // 3
    H = o_ref.shape[1]
    acc = jnp.full(o_ref.shape, -jnp.inf, dtype=jnp.float32)
    for j in range(3):
        for i in range(3):
            acc = jnp.maximum(acc, xs[:, j * Hp + i: j * Hp + i + H, :, :])
    o_ref[...] = acc


def _avgpool_kernel(xs_ref, inv_ref, o_ref):
    xs = xs_ref[...]
    Hp = xs_ref.shape[1] // 3
    H = o_ref.shape[1]
    acc = jnp.zeros(o_ref.shape, jnp.float32)
    for j in range(3):
        for i in range(3):
            acc = acc + xs[:, j * Hp + i: j * Hp + i + H, :, :]
    o_ref[...] = acc * inv_ref[...]         # count_include_pad=False


@functools.partial(jax.jit, static_argnames=('stride', 'mode'))
def pool3x3(x4, *, stride, mode):
    N, H, W, C = x4.shape
    pad_val = float('-inf') if mode == 'max' else 0.0
    xp = jnp.pad(x4, ((0, 0), (1, 1), (1, 1), (0, 0)),
                 constant_values=pad_val).astype(jnp.float32)
    Hp = H + 2
    Wo = (W - 1) // stride + 1               # W-strided output cols
    xs = jnp.concatenate(
        [xp[:, :, j: j + (Wo - 1) * stride + 1: stride, :] for j in range(3)],
        axis=1)
    xs_spec = pl.BlockSpec((1, 3 * Hp, Wo, C), lambda n: (n, 0, 0, 0))
    out_spec = pl.BlockSpec((1, H, Wo, C), lambda n: (n, 0, 0, 0))
    cp = pltpu.CompilerParams(dimension_semantics=("parallel",),
                              vmem_limit_bytes=_VMEM_LIMIT)
    if mode == 'max':
        y = pl.pallas_call(
            _maxpool_kernel, grid=(N,), in_specs=[xs_spec], out_specs=out_spec,
            out_shape=jax.ShapeDtypeStruct((N, H, Wo, C), jnp.float32),
            compiler_params=cp)(xs)
    else:
        ones = np.pad(np.ones((H, W), np.float32), ((1, 1), (1, 1)))
        cnt = np.zeros((H, W), np.float32)
        for i in range(3):
            for j in range(3):
                cnt += ones[i:i + H, j:j + W]
        cnt = cnt[:, ::stride]                # counts at the W-strided positions
        inv = jnp.asarray(1.0 / cnt)[None, :, :, None] * jnp.ones((1, 1, 1, C),
                                                                  jnp.float32)
        y = pl.pallas_call(
            _avgpool_kernel, grid=(N,),
            in_specs=[xs_spec, pl.BlockSpec((1, H, Wo, C), lambda n: (0, 0, 0, 0))],
            out_specs=out_spec,
            out_shape=jax.ShapeDtypeStruct((N, H, Wo, C), jnp.float32),
            compiler_params=cp)(xs, inv)
    if stride > 1:
        # TODO(synk): fold the H output stride into the kernel as well.
        y = y[:, ::stride, :, :]
    return y


# ----------------------------------------------------------------------------
# Global average pool
# ----------------------------------------------------------------------------

def _gap_kernel(x_ref, o_ref):
    o_ref[...] = jnp.mean(x_ref[...], axis=1)


@jax.jit
def global_avg_pool(x4):
    N, H, W, C = x4.shape
    return pl.pallas_call(
        _gap_kernel,
        out_shape=jax.ShapeDtypeStruct((N, C), jnp.float32),
    )(x4.reshape(N, H * W, C).astype(jnp.float32))


# ----------------------------------------------------------------------------
# Convolution glue
# ----------------------------------------------------------------------------

def conv1x1(x4, w, relu_in=False):
    N, H, W, C = x4.shape
    y = gemm(x4.reshape(N * H * W, C), w.reshape(-1, w.shape[-1]), relu_a=relu_in)
    return y.reshape(N, H, W, w.shape[-1])


def im2col(x4, k, stride, pad, dilation=1):
    N, H, W, C = x4.shape
    Ho = (H + 2 * pad - dilation * (k - 1) - 1) // stride + 1
    Wo = (W + 2 * pad - dilation * (k - 1) - 1) // stride + 1
    xp = jnp.pad(x4, ((0, 0), (pad, pad), (pad, pad), (0, 0)))
    cols = []
    for i in range(k):
        for j in range(k):
            hi, wj = i * dilation, j * dilation
            patch = xp[:, hi:hi + (Ho - 1) * stride + 1:stride,
                          wj:wj + (Wo - 1) * stride + 1:stride, :]
            cols.append(patch)
    return jnp.concatenate(cols, axis=-1).reshape(N * Ho * Wo, k * k * C), (N, Ho, Wo)


@jax.jit
def stem_conv3x3(x4, w):
    # Only conv still im2col-expanded (3x3 on the tiny raw input, Cin small).
    # TODO(synk): form patch columns in-kernel from a halo'd tile at real sizes.
    patches, (N, Ho, Wo) = im2col(x4, 3, 1, 1)
    y = gemm(patches, w.reshape(-1, w.shape[-1]))
    return y.reshape(N, Ho, Wo, w.shape[-1])


# ----------------------------------------------------------------------------
# DARTS ops / cells (BN + arch weight folded, mixed-op sum = running accumulation)
# ----------------------------------------------------------------------------

def fact_reduce_pre_bn(x4, w1, w2):
    # ReLU -> two stride-2 1x1 convs (even/odd offset) -> concat  (BN folded later)
    y1 = conv1x1(x4[:, ::2, ::2, :], w1, relu_in=True)
    y2 = conv1x1(x4[:, 1::2, 1::2, :], w2, relu_in=True)
    return jnp.concatenate([y1, y2], axis=-1)


def dil_pre_bn(x4, p, stride, pad, dil):
    # ReLU -> depthwise kxk -> pointwise 1x1   (BN folded later)
    y = depthwise_conv2d(x4, p['dw'], stride=stride, pad=pad, dil=dil, relu_in=True)
    return conv1x1(y, p['pw'])


def preproc_std(x4, w):                         # ReLU -> 1x1 conv -> BN(affine=False)
    y = conv1x1(x4, w, relu_in=True)
    return affine_apply(y, *bn_fold(y))


def preproc_reduce(x4, w1, w2):                 # FactorizedReduce -> BN(affine=False)
    y = fact_reduce_pre_bn(x4, w1, w2)
    return affine_apply(y, *bn_fold(y))


def mixed_op_contributions(x4, p, stride, w_ops):
    """(pre-BN output, scale, shift) per PRIMITIVES[1:] op; 'none' is exact zero.
    Arch weights are folded into the per-channel scale/shift so the mixed-op sum
    becomes a running accumulation (no 14-way stacked weighted sum)."""
    C = x4.shape[-1]
    contrib = []
    y = pool3x3(x4, stride=stride, mode='max')
    contrib.append((y,) + bn_fold(y, arch_w=w_ops[0]))
    y = pool3x3(x4, stride=stride, mode='avg')
    contrib.append((y,) + bn_fold(y, arch_w=w_ops[1]))
    if stride == 1:                                          # skip_connect (Identity)
        contrib.append((x4, w_ops[2] * jnp.ones((C,), jnp.float32),
                        jnp.zeros((C,), jnp.float32)))
    else:                                                    # FactorizedReduce
        y = fact_reduce_pre_bn(x4, p['skip_w1'], p['skip_w2'])
        contrib.append((y,) + bn_fold(y, arch_w=w_ops[2]))
    for idx, (key, _k, pad) in enumerate((('sep3', 3, 1), ('sep5', 5, 2))):
        sp = p[key]
        y1 = dil_pre_bn(x4, sp['a'], stride, pad, 1)
        z = affine_apply(y1, *bn_fold(y1))                   # inner BN of SepConv
        y2 = dil_pre_bn(z, sp['b'], 1, pad, 1)
        contrib.append((y2,) + bn_fold(y2, arch_w=w_ops[3 + idx]))
    for idx, (key, _k, pad, dil) in enumerate((('dil3', 3, 2, 2), ('dil5', 5, 4, 2))):
        y = dil_pre_bn(x4, p[key], stride, pad, dil)
        contrib.append((y,) + bn_fold(y, arch_w=w_ops[5 + idx]))
    return contrib


def search_cell(s0, s1, w_dag, p, n_nodes):
    reduction = p['reduction']
    if p['reduction_p']:
        s0 = preproc_reduce(s0, p['pre0_w1'], p['pre0_w2'])
    else:
        s0 = preproc_std(s0, p['pre0_w'])
    s1 = preproc_std(s1, p['pre1_w'])
    states = [s0, s1]
    for i in range(n_nodes):
        acc = None
        for j, h in enumerate(states):
            stride = 2 if (reduction and j < 2) else 1
            w_ops = w_dag[i][j, 1:]                          # drop 'none' weight
            for y4, scale, shift in mixed_op_contributions(h, p['dag'][i][j],
                                                           stride, w_ops):
                acc = affine_apply(y4, scale, shift, acc4=acc)
        states.append(acc)
    return jnp.concatenate(states[2:], axis=-1)


# ----------------------------------------------------------------------------
# RNN search cell (batched per-node edge GEMM + one mix kernel per node)
# ----------------------------------------------------------------------------

def _rnn_init_kernel(h_ref, c_ref, hh_ref, o_ref):
    h_prev = h_ref[...]
    c0 = jax.nn.sigmoid(c_ref[...])
    h0 = jnp.tanh(hh_ref[...])
    o_ref[...] = h_prev + c0 * (h0 - h_prev)


@jax.jit
def rnn_init_state(h_prev, c_pre, h_pre):
    B, H = h_prev.shape
    return pl.pallas_call(
        _rnn_init_kernel,
        out_shape=jax.ShapeDtypeStruct((B, H), jnp.float32),
    )(h_prev.astype(jnp.float32), c_pre.astype(jnp.float32), h_pre.astype(jnp.float32))


def _rnn_node_kernel(s_ref, c_ref, h_ref, w_ref, o_ref, *, n_states):
    out = jnp.zeros(o_ref.shape, jnp.float32)
    for j in range(n_states):
        s = s_ref[j]
        c = jax.nn.sigmoid(c_ref[j])
        h = h_ref[j]
        # RNN primitives minus 'none': tanh, relu, sigmoid, identity
        acts = (jnp.tanh(h), jnp.maximum(h, 0.0), jax.nn.sigmoid(h), h)
        for k, a in enumerate(acts):
            out = out + w_ref[j, k] * (s + c * (a - s))
    o_ref[...] = out


@jax.jit
def rnn_node_mix(s_stack, c_pre, h_pre, w_edges):
    ns, B, H = s_stack.shape
    return pl.pallas_call(
        functools.partial(_rnn_node_kernel, n_states=ns),
        in_specs=[pl.BlockSpec(memory_space=pltpu.MemorySpace.VMEM)] * 3
                 + [pl.BlockSpec(memory_space=pltpu.MemorySpace.SMEM)],
        out_specs=pl.BlockSpec(memory_space=pltpu.MemorySpace.VMEM),
        out_shape=jax.ShapeDtypeStruct((B, H), jnp.float32),
    )(s_stack.astype(jnp.float32), c_pre.astype(jnp.float32),
      h_pre.astype(jnp.float32), w_edges.astype(jnp.float32))


def _mean0_kernel(x_ref, o_ref):
    K = x_ref.shape[0]
    out = jnp.zeros(o_ref.shape, jnp.float32)
    for k in range(K):
        out = out + x_ref[k]
    o_ref[...] = out * (1.0 / K)


@jax.jit
def mean_states(stack):
    K, B, H = stack.shape
    return pl.pallas_call(
        _mean0_kernel,
        out_shape=jax.ShapeDtypeStruct((B, H), jnp.float32),
    )(stack.astype(jnp.float32))


def rnn_search_cell(x, h_prev, w_rnn, p):
    # TODO(synk): RNNSearchCell source not provided; follows the DARTS-RNN
    # search-cell semantics (eval-style, no dropout masks).
    B, nhid = h_prev.shape
    ch = gemm(jnp.concatenate([x, h_prev], axis=-1), p['W0'])
    s0 = rnn_init_state(h_prev, ch[:, :nhid], ch[:, nhid:])
    states = [s0]
    offset = 0
    for Wi in p['Ws']:
        ns = len(states)
        s_stack = jnp.stack(states, axis=0)                       # (ns, B, H)
        chn = gemm(s_stack.reshape(ns * B, nhid), Wi).reshape(ns, B, 2 * nhid)
        w_edges = w_rnn[offset:offset + ns, 1:]                   # drop 'none'
        states.append(rnn_node_mix(s_stack, chn[:, :, :nhid], chn[:, :, nhid:],
                                   w_edges))
        offset += ns
    return mean_states(jnp.stack(states[1:], axis=0))


# ----------------------------------------------------------------------------
# Full forward
# ----------------------------------------------------------------------------

def search_cnn_forward(params, x_nchw, weights_normal, weights_reduce, weights_rnn, cfg):
    x = jnp.transpose(x_nchw, (0, 2, 3, 1)).astype(jnp.float32)   # NCHW -> NHWC
    y = stem_conv3x3(x, params['stem_w'])                          # stem conv 3x3
    s0 = s1 = affine_apply(y, *bn_fold(y, gamma=params['stem_gamma'],
                                       beta=params['stem_beta']))
    for cell_p in params['cells']:
        w = weights_reduce if cell_p['reduction'] else weights_normal
        s0, s1 = s1, search_cell(s0, s1, w, cell_p, cfg['n_nodes'])
    rnn_s1 = global_avg_pool(s1)            # AdaptiveAvgPool2d(1) + flatten
    rnn_s0 = global_avg_pool(s0)
    for rnn_p in params['rnn_cells']:
        rnn_s0, rnn_s1 = rnn_s1, rnn_search_cell(rnn_s0, rnn_s1, weights_rnn, rnn_p)
    return gemm(rnn_s1, params['linear_w'], params['linear_b'])


# ----------------------------------------------------------------------------
# Deterministic parameter init
# ----------------------------------------------------------------------------

class KeyGen:
    def __init__(self, key):
        self.key = key

    def __call__(self):
        self.key, sub = jax.random.split(self.key)
        return sub


def nrm(key, shape, scale=0.1):
    return scale * jax.random.normal(key, shape, jnp.float32)


def init_mixed_op(kg, C, stride):
    p = {}
    if stride != 1:
        p['skip_w1'] = nrm(kg(), (1, 1, C, C // 2))
        p['skip_w2'] = nrm(kg(), (1, 1, C, C // 2))

    def dilp(k):
        return {'dw': nrm(kg(), (k, k, C)), 'pw': nrm(kg(), (1, 1, C, C))}

    p['sep3'] = {'a': dilp(3), 'b': dilp(3)}
    p['sep5'] = {'a': dilp(5), 'b': dilp(5)}
    p['dil3'] = dilp(3)
    p['dil5'] = dilp(5)
    return p


def init_cell(kg, n_nodes, C_pp, C_p, C, reduction_p, reduction):
    p = {'reduction_p': reduction_p, 'reduction': reduction}
    if reduction_p:
        p['pre0_w1'] = nrm(kg(), (1, 1, C_pp, C // 2))
        p['pre0_w2'] = nrm(kg(), (1, 1, C_pp, C // 2))
    else:
        p['pre0_w'] = nrm(kg(), (1, 1, C_pp, C))
    p['pre1_w'] = nrm(kg(), (1, 1, C_p, C))
    dag = []
    for i in range(n_nodes):
        edges = []
        for j in range(2 + i):
            stride = 2 if (reduction and j < 2) else 1
            edges.append(init_mixed_op(kg, C, stride))
        dag.append(edges)
    p['dag'] = dag
    return p


def init_search_cnn(key, C_in, C, n_classes, n_layers, n_nodes,
                    stem_multiplier, n_nodes_rnn, n_layers_rnn):
    kg = KeyGen(key)
    params = {}
    C_cur = stem_multiplier * C
    params['stem_w'] = nrm(kg(), (3, 3, C_in, C_cur))
    params['stem_gamma'] = jnp.ones((1, C_cur), jnp.float32)
    params['stem_beta'] = jnp.zeros((1, C_cur), jnp.float32)
    C_pp, C_p, C_cur = C_cur, C_cur, C
    cells = []
    reduction_p = False
    for i in range(n_layers):
        if i in [n_layers // 3, 2 * n_layers // 3]:
            C_cur *= 2
            reduction = True
        else:
            reduction = False
        cells.append(init_cell(kg, n_nodes, C_pp, C_p, C_cur, reduction_p, reduction))
        reduction_p = reduction
        C_pp, C_p = C_p, C_cur * n_nodes
    params['cells'] = cells
    params['linear_w'] = nrm(kg(), (C_p, n_classes))
    params['linear_b'] = nrm(kg(), (n_classes,))
    params['rnn_cells'] = [
        {'W0': nrm(kg(), (2 * C_p, 2 * C_p)),
         'Ws': [nrm(kg(), (C_p, 2 * C_p)) for _ in range(n_nodes_rnn)]}
        for _ in range(n_layers_rnn)]
    return params


# ----------------------------------------------------------------------------

if __name__ == "__main__":
    cfg = dict(C_in=4, C=4, n_classes=4, n_layers=4, n_nodes=2,
               stem_multiplier=3, n_nodes_rnn=2, n_layers_rnn=2)

    key = jax.random.PRNGKey(0)
    k_param, k_x, k_an, k_ar, k_arnn = jax.random.split(key, 5)

    params = init_search_cnn(k_param, **cfg)
    x = jax.random.normal(k_x, (2, cfg['C_in'], 16, 16), jnp.float32)   # NCHW input

    n_ops = len(PRIMITIVES)
    ka = jax.random.split(k_an, cfg['n_nodes'])
    kr = jax.random.split(k_ar, cfg['n_nodes'])
    weights_normal = [jax.nn.softmax(jax.random.normal(ka[i], (i + 2, n_ops)), axis=-1)
                      for i in range(cfg['n_nodes'])]
    weights_reduce = [jax.nn.softmax(jax.random.normal(kr[i], (i + 2, n_ops)), axis=-1)
                      for i in range(cfg['n_nodes'])]
    n_rnn_edges = cfg['n_nodes_rnn'] * (cfg['n_nodes_rnn'] + 1) // 2
    weights_rnn = jax.nn.softmax(
        jax.random.normal(k_arnn, (n_rnn_edges, len(RNN_PRIMITIVES))), axis=-1)

    logits = search_cnn_forward(params, x, weights_normal, weights_reduce,
                                weights_rnn, cfg)
    logits = jax.block_until_ready(logits)
    assert logits.shape == (2, cfg['n_classes'])
    print("KERNEL_OK")
</pallas_src>

<mosaic_0001>
module attributes {stable_mosaic.version = 11 : i64} {
  func.func @_gemm_kernel(%arg0: i32, %arg1: i32, %arg2: i32, %arg3: memref<256x128xbf16, #tpu.memory_space<vmem>>, %arg4: memref<128x128xbf16, #tpu.memory_space<vmem>>, %arg5: memref<1x128xf32, #tpu.memory_space<vmem>>, %arg6: memref<256x128xf32, #tpu.memory_space<vmem>>, %arg7: memref<256x128xf32, #tpu.memory_space<vmem>>) attributes {dimension_semantics = [#tpu.dimension_semantics<parallel>, #tpu.dimension_semantics<parallel>, #tpu.dimension_semantics<arbitrary>], iteration_bounds = array<i64: 2, 1, 1>, scalar_prefetch = 0 : i64, scratch_operands = 1 : i64, tpu.core_type = #tpu.core_type<tc>, window_params = [{transform_indices = @transform_0, window_bounds = array<i64: 256, 128>}, {transform_indices = @transform_1, window_bounds = array<i64: 128, 128>}, {transform_indices = @transform_2, window_bounds = array<i64: 1, 128>}, {transform_indices = @transform_3, window_bounds = array<i64: 256, 128>}]} {
    %c0_i32 = arith.constant 0 : i32
    %0 = arith.cmpi eq, %arg2, %c0_i32 : i32
    %1 = arith.extui %0 : i1 to i32
    %c0_i32_0 = arith.constant 0 : i32
    %2 = arith.cmpi ne, %1, %c0_i32_0 : i32
    scf.if %2 {
      %cst_10 = arith.constant 0.000000e+00 : f32
      %12 = vector.broadcast %cst_10 : f32 to vector<256x128xf32>
      %c0_11 = arith.constant 0 : index
      %c0_12 = arith.constant 0 : index
      %13 = vector.load %arg7[%c0_11, %c0_12] : memref<256x128xf32, #tpu.memory_space<vmem>>, vector<256x128xf32>
      tpu.vector_store %arg7[%c0_11, %c0_12], %12 {strides = array<i32>} : memref<256x128xf32, #tpu.memory_space<vmem>>, vector<256x128xf32>,
    } else {
    }
    %c0 = arith.constant 0 : index
    %c0_1 = arith.constant 0 : index
    %3 = vector.load %arg3[%c0, %c0_1] : memref<256x128xbf16, #tpu.memory_space<vmem>>, vector<256x128xbf16>
    %c0_2 = arith.constant 0 : index
    %c0_3 = arith.constant 0 : index
    %4 = vector.load %arg7[%c0_2, %c0_3] : memref<256x128xf32, #tpu.memory_space<vmem>>, vector<256x128xf32>
    %c0_4 = arith.constant 0 : index
    %c0_5 = arith.constant 0 : index
    %5 = vector.load %arg4[%c0_4, %c0_5] : memref<128x128xbf16, #tpu.memory_space<vmem>>, vector<128x128xbf16>
    %cst = arith.constant dense<0.000000e+00> : vector<256x128xf32>
    %6 = tpu.matmul %3, %5, %cst {dimension_numbers = #tpu.dot_dimension_numbers<[1], [0], [0], [1], [0, 0, 1, 1], [], []>} : vector<256x128xbf16>, vector<128x128xbf16>, vector<256x128xf32> -> vector<256x128xf32>
    %7 = arith.addf %4, %6 : vector<256x128xf32>
    %c0_6 = arith.constant 0 : index
    %c0_7 = arith.constant 0 : index
    %8 = vector.load %arg7[%c0_6, %c0_7] : memref<256x128xf32, #tpu.memory_space<vmem>>, vector<256x128xf32>
    tpu.vector_store %arg7[%c0_6, %c0_7], %7 {strides = array<i32>} : memref<256x128xf32, #tpu.memory_space<vmem>>, vector<256x128xf32>,
    %c0_i32_8 = arith.constant 0 : i32
    %9 = arith.cmpi eq, %arg2, %c0_i32_8 : i32
    %10 = arith.extui %9 : i1 to i32
    %c0_i32_9 = arith.constant 0 : i32
    %11 = arith.cmpi ne, %10, %c0_i32_9 : i32
    scf.if %11 {
      %c0_10 = arith.constant 0 : index
      %c0_11 = arith.constant 0 : index
      %12 = vector.load %arg7[%c0_10, %c0_11] : memref<256x128xf32, #tpu.memory_space<vmem>>, vector<256x128xf32>
      %c0_12 = arith.constant 0 : index
      %c0_13 = arith.constant 0 : index
      %13 = vector.load %arg5[%c0_12, %c0_13] : memref<1x128xf32, #tpu.memory_space<vmem>>, vector<1x128xf32>
      %14 = vector.broadcast %13 : vector<1x128xf32> to vector<256x128xf32>
      %15 = arith.addf %12, %14 : vector<256x128xf32>
      %c0_14 = arith.constant 0 : index
      %c0_15 = arith.constant 0 : index
      %16 = vector.load %arg6[%c0_14, %c0_15] : memref<256x128xf32, #tpu.memory_space<vmem>>, vector<256x128xf32>
      tpu.vector_store %arg6[%c0_14, %c0_15], %15 {strides = array<i32>} : memref<256x128xf32, #tpu.memory_space<vmem>>, vector<256x128xf32>,
    } else {
    }
    return
  }
  func.func @transform_0(%arg0: i32, %arg1: i32, %arg2: i32) -> (i32, i32) {
    %c0_i32 = arith.constant 0 : i32
    return %arg0, %arg2 : i32, i32
  }
  func.func @transform_1(%arg0: i32, %arg1: i32, %arg2: i32) -> (i32, i32) {
    %c0_i32 = arith.constant 0 : i32
    return %arg2, %arg1 : i32, i32
  }
  func.func @transform_2(%arg0: i32, %arg1: i32, %arg2: i32) -> (i32, i32) {
    %c0_i32 = arith.constant 0 : i32
    %c0_i32_0 = arith.constant 0 : i32
    return %c0_i32, %arg1 : i32, i32
  }
  func.func @transform_3(%arg0: i32, %arg1: i32, %arg2: i32) -> (i32, i32) {
    %c0_i32 = arith.constant 0 : i32
    return %arg0, %arg1 : i32, i32
  }
}

</mosaic_0001>

<bundles_post_ra>
// kernel: gemm.1
= control target key start
LH: loop header
LB: loop body
LE: loop exit
PB: predicated region body
PF: predicated region fallthrough
CT: control target
= control target key end

     0   :  { %s1112_s12 = smov 0   ;;  %s1114_s13 = smov 0   ;;  %s1265_s0 = inlined_call_operand.vmem [shape: bf16[512,128], index: 0, kind: input, shape index: {}]   ;;  %s1266_s1 = inlined_call_operand.vmem [shape: bf16[128,128], index: 1, kind: input, shape index: {}]   ;;  %s1267_s2 = inlined_call_operand.vmem [shape: f32[1,128], index: 2, kind: input, shape index: {}]   ;;  %s1268_s3 = inlined_call_operand.vmem [shape: f32[512,128], index: 3, kind: output, shape index: {}]  }
   0x1   :  { %s1116_s14 = smov 0  }
   0x2 LB: > { %s32_s15 = sadd.s32 1, %s1086_s13  ;;  %p892_p0 = scmp.ge.s32.totalorder %s1090_s14, 1  ;;  %s1090_s14 = sphi %s1116_s14, %s13_s14   ;;  %s1086_s13 = sphi %s1114_s13, %s1270_s13   ;;  %s1082_s12 = sphi %s1112_s12, %s1269_s12  }
   0x3   : > { %p34_p1 = scmp.ge.s32.totalorder %s32_s15, 2  ;;  %p188_p2 = scmp.lt.s32.totalorder %s1090_s14, 3 }
   0x5   : > { %s1272_s15 = smov (%p34_p1, %s32_s15), 0  ;;  %p189_p3 = pnand %p892_p0, %p188_p2 }
   0x6   : > { %s893_s24 = sshll.u32 (!%p189_p3), %s1082_s12, 5 }
   0x7   : > { %192 = sbr.rel (%p189_p3) target bundleno = 237 (0xed), region = 32  ;;  %p230_p4 = scmp.lt.s32.totalorder (!%p189_p3), %s893_s24, 63 }
   0xc   : > { %v1018_v0 = vld [vmem:[%s1266_s1 + $0x38] sm:$0xff]  ;;  %v1017_v1 = vld [vmem:[%s1266_s1 + $0x30] sm:$0xff]  ;;  %v1016_v2 = vld [vmem:[%s1266_s1 + $0x28] sm:$0xff]  ;;  %s1274_s24 = smov (!%p230_p4, %s893_s24), 63 }
   0xd   : > { %519 = vmatpush.bf16.msra.mxu0 %v1018_v0  ;;  %1019 = vmatpush.bf16.msra.mxu1 %v1018_v0  ;;  %v1015_v3 = vld [vmem:[%s1266_s1 + $0x20] sm:$0xff]  ;;  %v1014_v4 = vld [vmem:[%s1266_s1 + $0x18] sm:$0xff]  ;;  %v1013_v5 = vld [vmem:[%s1266_s1 + $0x10] sm:$0xff]  ;;  %s894_s4 = sshll.u32 %s1274_s24, 2  ;;  %s896_s10 = sshll.u32 %s1274_s24, 3 }
   0xe   : > { %1020 = vmatpush.bf16.msra.mxu2 %v1018_v0  ;;  %1021 = vmatpush.bf16.msra.mxu3 %v1018_v0  ;;  %v1012_v6 = vld [vmem:[%s1266_s1 + $0x8] sm:$0xff]  ;;  %v1011_v7 = vld [vmem:[%s1266_s1] sm:$0xff]  ;;  %s1163_s9 = scalar_lea.vmem %s1265_s0, %s894_s4  ;;  %s1190_s18 = scalar_lea.vmem %s1268_s3, %s896_s10 }
   0xf   : > { %v995_v8 = vld [vmem:[%s1163_s9] sm:$0xff]  ;;  %v996_v12 = vld [vmem:[%s1163_s9 + $0x8] sm:$0xff]  ;;  %v997_v16 = vld [vmem:[%s1163_s9 + $0x10] sm:$0xff] }
  0x10   : > { %v999_v9 = vld [vmem:[%s1163_s9 + $0x20] sm:$0xff]  ;;  %v1000_v13 = vld [vmem:[%s1163_s9 + $0x28] sm:$0xff]  ;;  %v1001_v17 = vld [vmem:[%s1163_s9 + $0x30] sm:$0xff] }
  0x11   : > { %520 = vmatpush.bf16.msra.mxu0 %v1017_v1  ;;  %1022 = vmatpush.bf16.msra.mxu1 %v1017_v1  ;;  %v1003_v10 = vld [vmem:[%s1163_s9 + $0x40] sm:$0xff]  ;;  %v1004_v14 = vld [vmem:[%s1163_s9 + $0x48] sm:$0xff]  ;;  %v1005_v18 = vld [vmem:[%s1163_s9 + $0x50] sm:$0xff] }
  0x12   : > { %1023 = vmatpush.bf16.msra.mxu2 %v1017_v1  ;;  %1024 = vmatpush.bf16.msra.mxu3 %v1017_v1  ;;  %v1007_v11 = vld [vmem:[%s1163_s9 + $0x60] sm:$0xff]  ;;  %v1008_v15 = vld [vmem:[%s1163_s9 + $0x68] sm:$0xff]  ;;  %v1009_v19 = vld [vmem:[%s1163_s9 + $0x70] sm:$0xff] }
  0x13   : > { %v998_v20 = vld [vmem:[%s1163_s9 + $0x18] sm:$0xff]  ;;  %v1185_v24 = vld [vmem:[%s1267_s2] ss:$0 sm:$0xff] }
  0x14   : > { %v1002_v21 = vld [vmem:[%s1163_s9 + $0x38] sm:$0xff] }
  0x15   : > { %521 = vmatpush.bf16.msra.mxu0 %v1016_v2  ;;  %1025 = vmatpush.bf16.msra.mxu1 %v1016_v2  ;;  %v1006_v22 = vld [vmem:[%s1163_s9 + $0x58] sm:$0xff] }
  0x16   : > { %1026 = vmatpush.bf16.msra.mxu2 %v1016_v2  ;;  %1027 = vmatpush.bf16.msra.mxu3 %v1016_v2  ;;  %v1010_v23 = vld [vmem:[%s1163_s9 + $0x78] sm:$0xff] }
  0x19   : > { %522 = vmatpush.bf16.msra.mxu0 %v1015_v3  ;;  %1028 = vmatpush.bf16.msra.mxu1 %v1015_v3 }
  0x1a   : > { %1029 = vmatpush.bf16.msra.mxu2 %v1015_v3  ;;  %1030 = vmatpush.bf16.msra.mxu3 %v1015_v3 }
  0x1d   : > { %523 = vmatpush.bf16.msra.mxu0 %v1014_v4  ;;  %1031 = vmatpush.bf16.msra.mxu1 %v1014_v4 }
  0x1e   : > { %1032 = vmatpush.bf16.msra.mxu2 %v1014_v4  ;;  %1033 = vmatpush.bf16.msra.mxu3 %v1014_v4 }
  0x21   : > { %524 = vmatpush.bf16.msra.mxu0 %v1013_v5  ;;  %1034 = vmatpush.bf16.msra.mxu1 %v1013_v5 }
  0x22   : > { %1035 = vmatpush.bf16.msra.mxu2 %v1013_v5  ;;  %1036 = vmatpush.bf16.msra.mxu3 %v1013_v5 }
  0x25   : > { %525 = vmatpush.bf16.msra.mxu0 %v1012_v6  ;;  %1037 = vmatpush.bf16.msra.mxu1 %v1012_v6 }
  0x26   : > { %1038 = vmatpush.bf16.msra.mxu2 %v1012_v6  ;;  %1039 = vmatpush.bf16.msra.mxu3 %v1012_v6 }
  0x29   : > { %526 = vmatpush.bf16.msra.mxu0 %v1011_v7  ;;  %1040 = vmatpush.bf16.msra.mxu1 %v1011_v7 }
  0x2a   : > { %1041 = vmatpush.bf16.msra.mxu2 %v1011_v7  ;;  %1042 = vmatpush.bf16.msra.mxu3 %v1011_v7 }
  0x2c   : > { %527 = vmatmul.bf16.vlgmr.msra.gmra.mxu0 %v995_v8  ;;  %547 = vmatmul.bf16.vlgmr.msra.gmra.mxu1 %v999_v9 }
  0x2d   : > { %567 = vmatmul.bf16.vlgmr.msra.gmra.mxu2 %v1003_v10  ;;  %587 = vmatmul.bf16.vlgmr.msra.gmra.mxu3 %v1007_v11 }
  0x3c   : > { %532 = vmatmul.bf16.gmra.mxu0 %v996_v12  ;;  %552 = vmatmul.bf16.gmra.mxu1 %v1000_v13 }
  0x3d   : > { %572 = vmatmul.bf16.gmra.mxu2 %v1004_v14  ;;  %592 = vmatmul.bf16.gmra.mxu3 %v1008_v15 }
  0x4c   : > { %537 = vmatmul.bf16.gmra.mxu0 %v997_v16  ;;  %557 = vmatmul.bf16.gmra.mxu1 %v1001_v17 }
  0x4d   : > { %577 = vmatmul.bf16.gmra.mxu2 %v1005_v18  ;;  %597 = vmatmul.bf16.gmra.mxu3 %v1009_v19 }
  0x5c   : > { %542 = vmatmul.bf16.gmra.mxu0 %v998_v20  ;;  %562 = vmatmul.bf16.gmra.mxu1 %v1002_v21 }
  0x5d   : > { %582 = vmatmul.bf16.gmra.mxu2 %v1006_v22  ;;  %602 = vmatmul.bf16.gmra.mxu3 %v1010_v23 }
  0xa9   : > { %v528_v25 = vpop.f32.mrf.mxu0  ;;  %v548_v26 = vpop.f32.mrf.mxu1 }
  0xaa   : > { %v711_v27 = vadd.f32 %v1185_v24, %v528_v25  ;;  %v719_v28 = vadd.f32 %v1185_v24, %v548_v26 }
  0xac   : > { %743 = vst [vmem:[%s1190_s18] sm:$0xff] %v711_v27 }
  0xad   : > { %751 = vst [vmem:[%s1190_s18 + $0x40] sm:$0xff] %v719_v28 }
  0xb0   : > { %v568_v29 = vpop.f32.mrf.mxu2  ;;  %v588_v30 = vpop.f32.mrf.mxu3 }
  0xb1   : > { %v727_v31 = vadd.f32 %v1185_v24, %v568_v29  ;;  %v735_v32 = vadd.f32 %v1185_v24, %v588_v30  ;;  %v530_v33 = vpop.f32.mrf.mxu0  ;;  %v550_v34 = vpop.f32.mrf.mxu1 }
  0xb2   : > { %v712_v35 = vadd.f32 %v1185_v24, %v530_v33  ;;  %v720_v36 = vadd.f32 %v1185_v24, %v550_v34 }
  0xb3   : > { %759 = vst [vmem:[%s1190_s18 + $0x80] sm:$0xff] %v727_v31 }
  0xb4   : > { %767 = vst [vmem:[%s1190_s18 + $0xc0] sm:$0xff] %v735_v32 }
  0xb5   : > { %744 = vst [vmem:[%s1190_s18 + $0x8] sm:$0xff] %v712_v35 }
  0xb6   : > { %752 = vst [vmem:[%s1190_s18 + $0x48] sm:$0xff] %v720_v36 }
  0xb8   : > { %v570_v37 = vpop.f32.mrf.mxu2  ;;  %v590_v38 = vpop.f32.mrf.mxu3 }
  0xb9   : > { %v728_v39 = vadd.f32 %v1185_v24, %v570_v37  ;;  %v736_v40 = vadd.f32 %v1185_v24, %v590_v38  ;;  %v533_v41 = vpop.f32.mrf.mxu0  ;;  %v553_v42 = vpop.f32.mrf.mxu1 }
  0xba   : > { %v713_v43 = vadd.f32 %v1185_v24, %v533_v41  ;;  %v721_v44 = vadd.f32 %v1185_v24, %v553_v42 }
  0xbb   : > { %760 = vst [vmem:[%s1190_s18 + $0x88] sm:$0xff] %v728_v39 }
  0xbc   : > { %768 = vst [vmem:[%s1190_s18 + $0xc8] sm:$0xff] %v736_v40 }
  0xbd   : > { %745 = vst [vmem:[%s1190_s18 + $0x10] sm:$0xff] %v713_v43 }
  0xbe   : > { %753 = vst [vmem:[%s1190_s18 + $0x50] sm:$0xff] %v721_v44 }
  0xc0   : > { %v573_v45 = vpop.f32.mrf.mxu2  ;;  %v593_v46 = vpop.f32.mrf.mxu3 }
  0xc1   : > { %v729_v47 = vadd.f32 %v1185_v24, %v573_v45  ;;  %v737_v48 = vadd.f32 %v1185_v24, %v593_v46  ;;  %v535_v49 = vpop.f32.mrf.mxu0  ;;  %v555_v50 = vpop.f32.mrf.mxu1 }
  0xc2   : > { %v714_v51 = vadd.f32 %v1185_v24, %v535_v49  ;;  %v722_v52 = vadd.f32 %v1185_v24, %v555_v50 }
  0xc3   : > { %761 = vst [vmem:[%s1190_s18 + $0x90] sm:$0xff] %v729_v47 }
  0xc4   : > { %769 = vst [vmem:[%s1190_s18 + $0xd0] sm:$0xff] %v737_v48 }
  0xc5   : > { %746 = vst [vmem:[%s1190_s18 + $0x18] sm:$0xff] %v714_v51 }
  0xc6   : > { %754 = vst [vmem:[%s1190_s18 + $0x58] sm:$0xff] %v722_v52 }
  0xc8   : > { %v575_v53 = vpop.f32.mrf.mxu2  ;;  %v595_v54 = vpop.f32.mrf.mxu3 }
  0xc9   : > { %v730_v55 = vadd.f32 %v1185_v24, %v575_v53  ;;  %v738_v56 = vadd.f32 %v1185_v24, %v595_v54  ;;  %v538_v57 = vpop.f32.mrf.mxu0  ;;  %v558_v58 = vpop.f32.mrf.mxu1 }
  0xca   : > { %v715_v59 = vadd.f32 %v1185_v24, %v538_v57  ;;  %v723_v60 = vadd.f32 %v1185_v24, %v558_v58 }
  0xcb   : > { %762 = vst [vmem:[%s1190_s18 + $0x98] sm:$0xff] %v730_v55 }
  0xcc   : > { %770 = vst [vmem:[%s1190_s18 + $0xd8] sm:$0xff] %v738_v56 }
  0xcd   : > { %747 = vst [vmem:[%s1190_s18 + $0x20] sm:$0xff] %v715_v59 }
  0xce   : > { %755 = vst [vmem:[%s1190_s18 + $0x60] sm:$0xff] %v723_v60 }
  0xd0   : > { %v578_v61 = vpop.f32.mrf.mxu2  ;;  %v598_v62 = vpop.f32.mrf.mxu3 }
  0xd1   : > { %v731_v63 = vadd.f32 %v1185_v24, %v578_v61  ;;  %v739_v0 = vadd.f32 %v1185_v24, %v598_v62  ;;  %v540_v1 = vpop.f32.mrf.mxu0  ;;  %v560_v2 = vpop.f32.mrf.mxu1 }
  0xd2   : > { %v716_v3 = vadd.f32 %v1185_v24, %v540_v1  ;;  %v724_v4 = vadd.f32 %v1185_v24, %v560_v2 }
  0xd3   : > { %763 = vst [vmem:[%s1190_s18 + $0xa0] sm:$0xff] %v731_v63 }
  0xd4   : > { %771 = vst [vmem:[%s1190_s18 + $0xe0] sm:$0xff] %v739_v0 }
  0xd5   : > { %748 = vst [vmem:[%s1190_s18 + $0x28] sm:$0xff] %v716_v3 }
  0xd6   : > { %756 = vst [vmem:[%s1190_s18 + $0x68] sm:$0xff] %v724_v4 }
  0xd8   : > { %v580_v5 = vpop.f32.mrf.mxu2  ;;  %v600_v6 = vpop.f32.mrf.mxu3 }
  0xd9   : > { %v732_v7 = vadd.f32 %v1185_v24, %v580_v5  ;;  %v740_v8 = vadd.f32 %v1185_v24, %v600_v6  ;;  %v543_v9 = vpop.f32.mrf.mxu0  ;;  %v563_v10 = vpop.f32.mrf.mxu1 }
  0xda   : > { %v717_v11 = vadd.f32 %v1185_v24, %v543_v9  ;;  %v725_v12 = vadd.f32 %v1185_v24, %v563_v10 }
  0xdb   : > { %764 = vst [vmem:[%s1190_s18 + $0xa8] sm:$0xff] %v732_v7 }
  0xdc   : > { %772 = vst [vmem:[%s1190_s18 + $0xe8] sm:$0xff] %v740_v8 }
  0xdd   : > { %749 = vst [vmem:[%s1190_s18 + $0x30] sm:$0xff] %v717_v11 }
  0xde   : > { %757 = vst [vmem:[%s1190_s18 + $0x70] sm:$0xff] %v725_v12 }
  0xe0   : > { %v583_v13 = vpop.f32.mrf.mxu2  ;;  %v603_v14 = vpop.f32.mrf.mxu3 }
  0xe1   : > { %v733_v15 = vadd.f32 %v1185_v24, %v583_v13  ;;  %v741_v16 = vadd.f32 %v1185_v24, %v603_v14  ;;  %v545_v17 = vpop.f32.mrf.mxu0  ;;  %v565_v18 = vpop.f32.mrf.mxu1 }
  0xe2   : > { %v718_v19 = vadd.f32 %v1185_v24, %v545_v17  ;;  %v726_v20 = vadd.f32 %v1185_v24, %v565_v18 }
  0xe3   : > { %765 = vst [vmem:[%s1190_s18 + $0xb0] sm:$0xff] %v733_v15 }
  0xe4   : > { %773 = vst [vmem:[%s1190_s18 + $0xf0] sm:$0xff] %v741_v16 }
  0xe5   : > { %750 = vst [vmem:[%s1190_s18 + $0x38] sm:$0xff] %v718_v19 }
  0xe6   : > { %758 = vst [vmem:[%s1190_s18 + $0x78] sm:$0xff] %v726_v20 }
  0xe8   : > { %v585_v21 = vpop.f32.mrf.mxu2  ;;  %v605_v22 = vpop.f32.mrf.mxu3 }
  0xe9   : > { %v734_v23 = vadd.f32 %v1185_v24, %v585_v21  ;;  %v742_v25 = vadd.f32 %v1185_v24, %v605_v22 }
  0xeb   : > { %766 = vst [vmem:[%s1190_s18 + $0xb8] sm:$0xff] %v734_v23 }
  0xec   : > { %774 = vst [vmem:[%s1190_s18 + $0xf8] sm:$0xff] %v742_v25 }
  0xed PF: > { %s13_s14 = sadd.s32 1, %s1090_s14   ;;  %s1269_s12 = smov %s1086_s13 }
  0xee   : > { %p10_p5 = scmp.ge.s32.totalorder %s13_s14, 4   ;;  %s1270_s13 = smov %s1272_s15 }
  0xf0   :  { %12 = sbr.rel (!%p10_p5) target bundleno = 2 (0x2), region = 76 }

</bundles_post_ra>
